<compile_context>
chip_gen: v6e
topology: v6e:2x2x1
jax: 0.10.0
libtpu: 0.0.40
codegen_flags: <defaults>
</compile_context>

<pallas_src>
import functools
import math

import jax
import jax.numpy as jnp
from jax.experimental import pallas as pl
from jax.experimental.pallas import tpu as pltpu


def _fused_kernel(seed_ref, *refs, p, has_bias):
    """(x [+ bias]) -> inverted dropout(p) -> + residual, all on the VPU.

    seed_ref : SMEM (1,) int32  (scalar-prefetched dropout seed)
    refs     : VMEM (TR, W) x / [ (1, W) bias / ] (TR, W) residual / (TR, W) out
    """
    if has_bias:
        x_ref, b_ref, r_ref, o_ref = refs
        a = x_ref[...] + b_ref[...]          # (1, W) broadcasts over rows
    else:
        x_ref, r_ref, o_ref = refs
        a = x_ref[...]

    if p > 0.0:
        rows, cols = a.shape
        # Global element index (row-major) -> identical mask for any tiling.
        base_row = pl.program_id(0) * rows
        row_ids = jax.lax.broadcasted_iota(jnp.int32, (rows, cols), 0) + base_row
        col_ids = jax.lax.broadcasted_iota(jnp.int32, (rows, cols), 1)
        idx = (row_ids * cols + col_ids).astype(jnp.uint32)

        # Counter-based hash PRNG (splitmix/murmur-style 32-bit finalizer).
        seed_u = seed_ref[0].astype(jnp.uint32)
        h = idx ^ (seed_u * jnp.uint32(0x9E3779B9))
        h = (h ^ (h >> 16)) * jnp.uint32(0x7FEB352D)
        h = (h ^ (h >> 15)) * jnp.uint32(0x846CA68B)
        h = h ^ (h >> 16)

        # Top 24 bits as a non-negative int32, compared against an integer
        # threshold -> no float convert, single compare + single multiply.
        bits24 = (h >> 8).astype(jnp.int32)              # in [0, 2**24)
        thr = jnp.int32(int(round(p * (1 << 24))))
        keep = bits24 >= thr
        inv_keep = jnp.asarray(1.0 / (1.0 - p), a.dtype)
        a = jnp.where(keep, a * inv_keep, jnp.zeros_like(a))

    o_ref[...] = a + r_ref[...]


def _lcm(a, b):
    return a * b // math.gcd(a, b)


def _choose_layout(n_rows, hidden):
    """Pick a lane-dense working layout [rows, width] with width % 128 == 0
    whenever possible.  Returns (rows, width, fold): `fold` original rows are
    packed into one working row (pure row-major reshape)."""
    if hidden % 128 == 0:
        return n_rows, hidden, 1
    fold = _lcm(hidden, 128) // hidden
    if fold > 1 and n_rows % fold == 0:
        return n_rows // fold, hidden * fold, fold
    return n_rows, hidden, 1          # fallback: partially filled lanes


def _pick_row_tile(rows, width, itemsize, target_bytes=2 * 1024 * 1024):
    """Largest multiple-of-8 row tile with ~target_bytes per buffer.

    3 streamed arrays x 2 pipeline buffers x 2 MiB ~= 12 MiB of VMEM:
    fits v5e's 16 MiB default scoped limit and leaves headroom on
    v6e/v7x (32 MiB scoped) while being big enough (>= 512 f32 rows at
    H<=1024) to sit near the HBM roofline."""
    tr = target_bytes // max(1, width * itemsize)
    tr = max(8, (int(tr) // 8) * 8)
    tr = min(tr, 1024)
    if rows <= tr:
        return rows                    # single block == full dim (always legal)
    return tr


def nv_fused_bias_dropout_res(x, residual, bias, p, seed, training=True,
                              row_tile=None):
    """x, residual: [..., H]; bias: [H] or None; p: static Python float."""
    assert p < 1.0, "p must be < 1"
    p_eff = float(p) if training else 0.0

    orig_shape = x.shape
    H = orig_shape[-1]
    R = math.prod(orig_shape[:-1])

    rows, width, fold = _choose_layout(R, H)
    x2 = x.reshape(rows, width)
    r2 = residual.astype(x.dtype).reshape(rows, width)

    has_bias = bias is not None
    args = [x2]
    in_specs = [pl.BlockSpec(None, None)]  # placeholder, filled below

    itemsize = jnp.dtype(x.dtype).itemsize
    tr = row_tile if row_tile is not None else _pick_row_tile(rows, width, itemsize)
    tr = min(tr, rows)
    grid = (pl.cdiv(rows, tr),)

    row_spec = pl.BlockSpec((tr, width), lambda i, s: (i, 0))
    in_specs = [row_spec]
    if has_bias:
        bias2 = bias.astype(x.dtype).reshape(1, H)
        if fold > 1:
            bias2 = jnp.tile(bias2, (1, fold))          # (1, width)
        args.append(bias2)
        in_specs.append(pl.BlockSpec((1, width), lambda i, s: (0, 0)))
    args.append(r2)
    in_specs.append(row_spec)

    seed_arr = jnp.asarray(seed, dtype=jnp.int32).reshape(1)
    kernel = functools.partial(_fused_kernel, p=p_eff, has_bias=has_bias)

    out2 = pl.pallas_call(
        kernel,
        out_shape=jax.ShapeDtypeStruct((rows, width), x.dtype),
        grid_spec=pltpu.PrefetchScalarGridSpec(
            num_scalar_prefetch=1,            # seed lives in SMEM
            grid=grid,
            in_specs=in_specs,
            out_specs=row_spec,
        ),
        compiler_params=pltpu.CompilerParams(
            dimension_semantics=("parallel",),            # megacore on v7x
            vmem_limit_bytes=32 * 1024 * 1024,
        ),
    )(seed_arr, *args)

    return out2.reshape(orig_shape)


if __name__ == "__main__":
    key = jax.random.PRNGKey(0)
    kx, kr = jax.random.split(key)

    B, S, H = 2, 8, 32
    p = 0.1

    x = jax.random.normal(kx, (B, S, H), dtype=jnp.float32)
    residual = jax.random.normal(kr, (B, S, H), dtype=jnp.float32)
    # Module init: bias = zeros(bias_shape) -> deterministic zeros of shape [H]
    bias = jnp.zeros((H,), dtype=jnp.float32)

    # Training path (dropout active, bias present).
    out_train = nv_fused_bias_dropout_res(x, residual, bias, p, seed=1234,
                                          training=True)
    jax.block_until_ready(out_train)

    # Eval path (p_eff = 0): must equal x + bias + residual.
    out_eval = nv_fused_bias_dropout_res(x, residual, bias, p, seed=1234,
                                         training=False)
    jax.block_until_ready(out_eval)
    ref_eval = x + bias.reshape(1, 1, H) + residual
    assert jnp.allclose(out_eval, ref_eval, atol=1e-6), "eval-path mismatch"

    # bias=None specialization (no bias DMA / add inside the kernel).
    out_nobias = nv_fused_bias_dropout_res(x, residual, None, p, seed=7,
                                           training=False)
    assert jnp.allclose(out_nobias, x + residual, atol=1e-6), "no-bias mismatch"

    # Training sanity: every element is residual (dropped) or
    # (x + bias)/(1-p) + residual (kept).
    kept_val = (x + bias.reshape(1, 1, H)) / (1.0 - p) + residual
    is_kept = jnp.isclose(out_train, kept_val, atol=1e-5)
    is_drop = jnp.isclose(out_train, residual, atol=1e-5)
    assert bool(jnp.all(is_kept | is_drop)), "training-path element mismatch"

    # Tiling invariance of the dropout mask: different row tiles (grid of 1
    # block vs 4 blocks) must give bit-identical results for the same seed.
    B2, S2 = 2, 64
    xb = jax.random.normal(kx, (B2, S2, H), dtype=jnp.float32)
    rb = jax.random.normal(kr, (B2, S2, H), dtype=jnp.float32)
    o_one = nv_fused_bias_dropout_res(xb, rb, bias, p, seed=42, training=True)
    o_tiled = nv_fused_bias_dropout_res(xb, rb, bias, p, seed=42, training=True,
                                        row_tile=8)
    jax.block_until_ready(o_tiled)
    assert bool(jnp.array_equal(o_one, o_tiled)), "tiling-dependent dropout mask"

    print("KERNEL_OK")
</pallas_src>

<mosaic_0001>
module attributes {stable_mosaic.version = 11 : i64} {
  func.func @_fused_kernel(%arg0: i32, %arg1: memref<1xi32, #tpu.memory_space<smem>>, %arg2: memref<4x128xf32, #tpu.memory_space<vmem>>, %arg3: memref<1x128xf32, #tpu.memory_space<vmem>>, %arg4: memref<4x128xf32, #tpu.memory_space<vmem>>, %arg5: memref<4x128xf32, #tpu.memory_space<vmem>>) attributes {dimension_semantics = [#tpu.dimension_semantics<parallel>], iteration_bounds = array<i64: 1>, scalar_prefetch = 1 : i64, scratch_operands = 0 : i64, tpu.core_type = #tpu.core_type<tc>, window_params = [{transform_indices = @transform_0, window_bounds = array<i64: 4, 128>}, {pipeline_mode = #tpu.pipeline_mode<synchronous>, transform_indices = @transform_1, window_bounds = array<i64: 1, 128>}, {transform_indices = @transform_2, window_bounds = array<i64: 4, 128>}, {transform_indices = @transform_3, window_bounds = array<i64: 4, 128>}]} {
    %c0 = arith.constant 0 : index
    %c0_0 = arith.constant 0 : index
    %0 = vector.load %arg2[%c0, %c0_0] : memref<4x128xf32, #tpu.memory_space<vmem>>, vector<4x128xf32>
    %c0_1 = arith.constant 0 : index
    %c0_2 = arith.constant 0 : index
    %1 = vector.load %arg3[%c0_1, %c0_2] : memref<1x128xf32, #tpu.memory_space<vmem>>, vector<1x128xf32>
    %2 = vector.broadcast %1 : vector<1x128xf32> to vector<4x128xf32>
    %3 = arith.addf %0, %2 : vector<4x128xf32>
    %c4_i32 = arith.constant 4 : i32
    %4 = arith.muli %arg0, %c4_i32 : i32
    %5 = tpu.iota {dimensions = array<i32: 0>} : vector<4x128xi32>
    %6 = vector.broadcast %4 : i32 to vector<4x128xi32>
    %7 = arith.addi %5, %6 : vector<4x128xi32>
    %8 = tpu.iota {dimensions = array<i32: 1>} : vector<4x128xi32>
    %c128_i32 = arith.constant 128 : i32
    %9 = vector.broadcast %c128_i32 : i32 to vector<4x128xi32>
    %10 = arith.muli %7, %9 : vector<4x128xi32>
    %11 = arith.addi %10, %8 : vector<4x128xi32>
    %c0_3 = arith.constant 0 : index
    %12 = memref.load %arg1[%c0_3] : memref<1xi32, #tpu.memory_space<smem>>
    %c-1640531527_i32 = arith.constant -1640531527 : i32
    %13 = arith.muli %12, %c-1640531527_i32 : i32
    %14 = vector.broadcast %13 : i32 to vector<4x128xi32>
    %15 = arith.xori %11, %14 : vector<4x128xi32>
    %c16_i32 = arith.constant 16 : i32
    %16 = vector.broadcast %c16_i32 : i32 to vector<4x128xi32>
    %17 = arith.shrui %15, %16 : vector<4x128xi32>
    %18 = arith.xori %15, %17 : vector<4x128xi32>
    %c2146121005_i32 = arith.constant 2146121005 : i32
    %19 = vector.broadcast %c2146121005_i32 : i32 to vector<4x128xi32>
    %20 = arith.muli %18, %19 : vector<4x128xi32>
    %c15_i32 = arith.constant 15 : i32
    %21 = vector.broadcast %c15_i32 : i32 to vector<4x128xi32>
    %22 = arith.shrui %20, %21 : vector<4x128xi32>
    %23 = arith.xori %20, %22 : vector<4x128xi32>
    %c-2073254261_i32 = arith.constant -2073254261 : i32
    %24 = vector.broadcast %c-2073254261_i32 : i32 to vector<4x128xi32>
    %25 = arith.muli %23, %24 : vector<4x128xi32>
    %c16_i32_4 = arith.constant 16 : i32
    %26 = vector.broadcast %c16_i32_4 : i32 to vector<4x128xi32>
    %27 = arith.shrui %25, %26 : vector<4x128xi32>
    %28 = arith.xori %25, %27 : vector<4x128xi32>
    %c8_i32 = arith.constant 8 : i32
    %29 = vector.broadcast %c8_i32 : i32 to vector<4x128xi32>
    %30 = arith.shrui %28, %29 : vector<4x128xi32>
    %c1677722_i32 = arith.constant 1677722 : i32
    %31 = vector.broadcast %c1677722_i32 : i32 to vector<4x128xi32>
    %32 = arith.cmpi sge, %30, %31 : vector<4x128xi32>
    %cst = arith.constant 1.11111116 : f32
    %33 = vector.broadcast %cst : f32 to vector<4x128xf32>
    %34 = arith.mulf %3, %33 : vector<4x128xf32>
    %cst_5 = arith.constant 0.000000e+00 : f32
    %35 = vector.broadcast %cst_5 : f32 to vector<4x128xf32>
    %36 = arith.select %32, %34, %35 : vector<4x128xi1>, vector<4x128xf32>
    %c0_6 = arith.constant 0 : index
    %c0_7 = arith.constant 0 : index
    %37 = vector.load %arg4[%c0_6, %c0_7] : memref<4x128xf32, #tpu.memory_space<vmem>>, vector<4x128xf32>
    %38 = arith.addf %36, %37 : vector<4x128xf32>
    %c0_8 = arith.constant 0 : index
    %c0_9 = arith.constant 0 : index
    %39 = vector.load %arg5[%c0_8, %c0_9] : memref<4x128xf32, #tpu.memory_space<vmem>>, vector<4x128xf32>
    tpu.vector_store %arg5[%c0_8, %c0_9], %38 {strides = array<i32>} : memref<4x128xf32, #tpu.memory_space<vmem>>, vector<4x128xf32>,
    return
  }
  func.func @transform_0(%arg0: i32, %arg1: memref<1xi32, #tpu.memory_space<smem>>) -> (i32, i32) {
    %c0_i32 = arith.constant 0 : i32
    %c0_i32_0 = arith.constant 0 : i32
    return %arg0, %c0_i32 : i32, i32
  }
  func.func @transform_1(%arg0: i32, %arg1: memref<1xi32, #tpu.memory_space<smem>>) -> (i32, i32) {
    %c0_i32 = arith.constant 0 : i32
    %c0_i32_0 = arith.constant 0 : i32
    %c0_i32_1 = arith.constant 0 : i32
    return %c0_i32, %c0_i32_0 : i32, i32
  }
  func.func @transform_2(%arg0: i32, %arg1: memref<1xi32, #tpu.memory_space<smem>>) -> (i32, i32) {
    %c0_i32 = arith.constant 0 : i32
    %c0_i32_0 = arith.constant 0 : i32
    return %arg0, %c0_i32 : i32, i32
  }
  func.func @transform_3(%arg0: i32, %arg1: memref<1xi32, #tpu.memory_space<smem>>) -> (i32, i32) {
    %c0_i32 = arith.constant 0 : i32
    %c0_i32_0 = arith.constant 0 : i32
    return %arg0, %c0_i32 : i32, i32
  }
}

</mosaic_0001>

<bundles_post_ra>
// kernel: tpu_custom_call.1
= control target key start
LH: loop header
LB: loop body
LE: loop exit
PB: predicated region body
PF: predicated region fallthrough
CT: control target
= control target key end

     0   :  { %10 = vsyncpa [#allocation5], 0  ;;  %s170_s0 = inlined_call_operand.<no memory space> [shape: s32[1], index: 0, kind: input, shape index: {}]   ;;  %s171_s1 = inlined_call_operand.hbm [shape: f32[4,128], index: 1, kind: input, shape index: {}]   ;;  %s172_s2 = inlined_call_operand.vmem [shape: f32[1,128], index: 2, kind: input, shape index: {}]   ;;  %s173_s3 = inlined_call_operand.vmem [shape: f32[4,128], index: 3, kind: input, shape index: {}]   ;;  %s174_s4 = inlined_call_operand.hbm [shape: f32[4,128], index: 4, kind: output, shape index: {}]  }
   0x1   :  { %11 = vsyncpa [#allocation6], 0  ;;  %s128_s15 = smov [#allocation4]  }
   0x2   :  { %s18_s16 = sshll.u32 %s128_s15, 4  ;;  %s19_s16 = int_to_ptr.vmem [resolvable:$true] %s18_s16 }
   0x3   :  { %s92_s17 = scalar_lea.vmem %s19_s16, 64  ;;  %p97_p1 = scmp.lt.s32.totalorder %s19_s16, %s19_s16 }
   0x4   :  { %p93_p0 = scmp.ne.s32.totalorder %s19_s16, %s92_s17  ;;  %p98_p2 = scmp.lt.s32.totalorder %s92_s17, %s92_s17 }
   0x6   :  { %p99_p3 = por %p98_p2, %p97_p1 }
   0x8   :  { %p100_p4 = pnand %p99_p3, %p93_p0 }
   0xa   :  { %103 = shalt.err (!%p100_p4)
}
   0xb   :  { %21 = dma.hbm_to_vmem [thread:$0]  %s171_s1, 64, %s19_s16, [#allocation5]  }
   0xc   :  { %124 = dma.done.wait [#allocation5], 64  }
   0xd   :  { %125 = vsyncadd [#allocation5], 4294967232  ;;  %v39_v0 = vlaneseq  ;;  %s48_s22 = smul.u32 2654435769, %s170_s0  ;;  %v29_v11 = vld [vmem:[#allocation4] sm:$0xf] }
   0xe   :  { %v81_v12 = vld [vmem:[%s172_s2] ss:$0 sm:$0xff]  ;;  %s129_s25 = smov [#allocation7]  }
   0xf   :  { %v40_v1 = vshrl.u32 %v39_v0, 7  ;;  %v44_v2 = vand.u32 127, %v39_v0  ;;  %v49_v4 = vstv %s48_s22  ;;  %v37_v15 = vadd.f32 %v81_v12, %v29_v11  ;;  %v63_v20 = vld [vmem:[%s173_s3] sm:$0xf]  ;;  %s72_s26 = sshll.u32 %s129_s25, 4  ;;  %s73_s26 = int_to_ptr.vmem [resolvable:$true] %s72_s26 }
  0x10   :  { %s104_s27 = scalar_lea.vmem %s73_s26, 64  ;;  %p109_p6 = scmp.lt.s32.totalorder %s73_s26, %s73_s26 }
  0x11   :  { %v45_v3 = vmul.u32 128, %v40_v1  ;;  %v61_v18 = vmul.f32 1.1111112, %v37_v15  ;;  %p105_p5 = scmp.ne.s32.totalorder %s73_s26, %s104_s27  ;;  %p110_p7 = scmp.lt.s32.totalorder %s104_s27, %s104_s27 }
  0x13   :  { %v46_v5 = vadd.s32 %v45_v3, %v44_v2  ;;  %p111_p8 = por %p110_p7, %p109_p6 }
  0x15   :  { %v50_v6 = vxor.u32 %v49_v4, %v46_v5  ;;  %p112_p9 = pnand %p111_p8, %p105_p5 }
  0x17   :  { %v51_v7 = vshrl.u32 %v50_v6, 16 }
  0x19   :  { %v52_v8 = vxor.u32 %v51_v7, %v50_v6 }
  0x1b   :  { %v53_v9 = vmul.u32 2146121005, %v52_v8 }
  0x1d   :  { %v54_v10 = vshrl.u32 %v53_v9, 15 }
  0x1f   :  { %v55_v13 = vxor.u32 %v54_v10, %v53_v9 }
  0x21   :  { %v56_v14 = vmul.u32 2221713035, %v55_v13 }
  0x23   :  { %v57_v16 = vshrl.u32 %v56_v14, 16 }
  0x25   :  { %v58_v17 = vxor.u32 %v57_v16, %v56_v14 }
  0x27   :  { %v59_v19 = vshrl.u32 %v58_v17, 8 }
  0x29   :  { %vm60_vm0 = vcmp.ge.s32.totalorder %v59_v19, 1677722 }
  0x2a   :  { %v62_v21 = vsel %vm60_vm0, %v61_v18, 0.0 }
  0x2b   :  { %v64_v22 = vadd.f32 %v63_v20, %v62_v21 }
  0x2d   :  { %65 = vst [vmem:[#allocation7] sm:$0xf] %v64_v22 }
  0x2e   :  { %115 = shalt.err (!%p112_p9)
}
  0x2f   :  { %75 = dma.vmem_to_hbm [thread:$0]  %s73_s26, 64, %s174_s4, [#allocation6]  }
  0x30   :  { %126 = dma.done.wait [#allocation6], 64  }
  0x31   :  { %127 = vsyncadd [#allocation6], 4294967232 }
  0x32   :  { %79 = vsyncpa [#allocation5], 1 }
  0x33   :  { %80 = vsyncpa [#allocation6], 1 }

</bundles_post_ra>
